<compile_context>
chip_gen: v5e
topology: v5e:2x2
jax: 0.10.0
libtpu: 0.0.40
codegen_flags: <defaults>
</compile_context>

<pallas_src>
import math

import jax
import jax.numpy as jnp
from jax.experimental import pallas as pl
from jax.experimental.pallas import tpu as pltpu


def _round_up(x: int, m: int) -> int:
    return ((x + m - 1) // m) * m


def _linear_kernel(x_ref, w_ref, b_ref, o_ref):
    # x_ref: (TILE, K)  packed activation rows (K = pack*D, lane-dense)
    # w_ref: (K, M)     block-diagonal expanded weight (M = pack*F), resident
    # b_ref: (1, M)     expanded bias, resident
    # o_ref: (TILE, M)  packed output (lane-dense when M == 128)
    acc = jnp.dot(x_ref[...], w_ref[...], preferred_element_type=jnp.float32)
    o_ref[...] = (acc + b_ref[...]).astype(o_ref.dtype)


def _expand_params(w, b, pack):
    """Block-diagonal weight / tiled bias for the lane-packed matmul.

    w_exp[g*D + d, g*F + c] = w[c, d]      b_exp[0, g*F + c] = b[c]
    so that  (x.reshape(N//pack, pack*D) @ w_exp + b_exp).reshape(N, F)
    equals   x @ w.T + b  exactly (both reshapes are contiguous bitcasts).
    """
    F, D = w.shape
    eye = jnp.eye(pack, dtype=w.dtype)
    w_exp = (eye[:, None, :, None] * w.T[None, :, None, :]).reshape(pack * D, pack * F)
    b_exp = jnp.tile(b, pack).reshape(1, pack * F)
    return w_exp, b_exp


@jax.jit
def classifier_nn_forward(x, w, b):
    """Pallas equivalent of nn.Linear(D, 2): out = x @ w.T + b.

    x: (N, D) f32, w: (F=2, D) f32 (PyTorch Linear layout), b: (F,) f32.
    Returns (N, F) f32.
    """
    N, D = x.shape
    F = w.shape[0]
    itemsize = x.dtype.itemsize

    # Pack factor: fuse `pack` rows so input (pack*D) and output (pack*F)
    # lanes are dense.  Constrained to a divisor of N so both reshapes are
    # free bitcasts, and to keep the expanded weight small (<= 4 MiB).
    pack = 128 // F if (F <= 128 and 128 % F == 0) else 1
    pack = math.gcd(N, pack)                       # power of two, divides N
    while pack > 1 and (pack * D) * (pack * F) * itemsize > 4 * 1024 * 1024:
        pack //= 2                                 # still divides N
    K = pack * D
    M = pack * F
    rows = N // pack                               # packed rows seen by kernel

    w_exp, b_exp = _expand_params(w.astype(x.dtype), b.astype(x.dtype), pack)
    x_packed = x.reshape(rows, K)                  # contiguous reshape: free

    # Tile selection: ~8-9 MiB of packed x per buffer; keep >= 2 grid steps
    # when possible (v7x megacore); full-extent single block for tiny inputs.
    vmem_budget = 9 * 1024 * 1024                  # per (x + out) buffer set
    bytes_per_row = (_round_up(K, 128) + _round_up(M, 128)) * itemsize
    max_tile = max(8, (vmem_budget // bytes_per_row) // 8 * 8)
    tile = min(max_tile, _round_up(pl.cdiv(rows, 2), 8))
    if tile >= rows:
        tile = rows                                # single full-extent block
    grid = pl.cdiv(rows, tile)                     # ragged last block is masked

    out_packed = pl.pallas_call(
        _linear_kernel,
        out_shape=jax.ShapeDtypeStruct((rows, M), x.dtype),
        grid_spec=pltpu.PrefetchScalarGridSpec(
            num_scalar_prefetch=0,
            grid=(grid,),
            in_specs=[
                pl.BlockSpec((tile, K), lambda i: (i, 0)),   # packed x rows
                pl.BlockSpec((K, M), lambda i: (0, 0)),      # weight, resident
                pl.BlockSpec((1, M), lambda i: (0, 0)),      # bias, resident
            ],
            out_specs=pl.BlockSpec((tile, M), lambda i: (i, 0)),
        ),
        compiler_params=pltpu.CompilerParams(
            dimension_semantics=("parallel",),
            vmem_limit_bytes=32 * 1024 * 1024,
        ),
        cost_estimate=pl.CostEstimate(
            flops=2 * N * D * F,
            transcendentals=0,
            bytes_accessed=(N * D + N * F + K * M + M) * itemsize,
        ),
    )(x_packed, w_exp, b_exp)

    return out_packed.reshape(N, F)                # contiguous reshape: free


def reference_forward(x, w, b):
    return x @ w.T + b


if __name__ == "__main__":
    key = jax.random.PRNGKey(0)
    kx, kw, kb = jax.random.split(key, 3)

    # Small shapes consistent with the module: Linear(D=32, 2) over N rows.
    # N % 64 == 0 -> fully lane-packed zero-copy path; rows=15 with tile=8
    # also exercises the multi-step grid with a ragged (masked) last block.
    N, D = 960, 32

    x = jax.random.normal(kx, (N, D), dtype=jnp.float32)
    bound = 1.0 / (D ** 0.5)      # mimic nn.Linear's default uniform init
    w = jax.random.uniform(kw, (2, D), minval=-bound, maxval=bound,
                           dtype=jnp.float32)
    b = jax.random.uniform(kb, (2,), minval=-bound, maxval=bound,
                           dtype=jnp.float32)

    out = jax.block_until_ready(classifier_nn_forward(x, w, b))
    ref = reference_forward(x, w, b)

    assert out.shape == (N, 2)
    assert jnp.allclose(out, ref, atol=1e-5, rtol=1e-5)
    print("KERNEL_OK")
</pallas_src>

<mosaic_0001>
module attributes {stable_mosaic.version = 11 : i64} {
  func.func @_linear_kernel(%arg0: i32, %arg1: memref<8x2048xf32, #tpu.memory_space<vmem>>, %arg2: memref<2048x128xf32, #tpu.memory_space<vmem>>, %arg3: memref<1x128xf32, #tpu.memory_space<vmem>>, %arg4: memref<8x128xf32, #tpu.memory_space<vmem>>) attributes {dimension_semantics = [#tpu.dimension_semantics<parallel>], iteration_bounds = array<i64: 2>, scalar_prefetch = 0 : i64, scratch_operands = 0 : i64, tpu.core_type = #tpu.core_type<tc>, window_params = [{transform_indices = @transform_0, window_bounds = array<i64: 8, 2048>}, {pipeline_mode = #tpu.pipeline_mode<synchronous>, transform_indices = @transform_1, window_bounds = array<i64: 2048, 128>}, {pipeline_mode = #tpu.pipeline_mode<synchronous>, transform_indices = @transform_2, window_bounds = array<i64: 1, 128>}, {transform_indices = @transform_3, window_bounds = array<i64: 8, 128>}]} {
    %c0 = arith.constant 0 : index
    %c0_0 = arith.constant 0 : index
    %0 = vector.load %arg1[%c0, %c0_0] : memref<8x2048xf32, #tpu.memory_space<vmem>>, vector<8x2048xf32>
    %c0_1 = arith.constant 0 : index
    %c0_2 = arith.constant 0 : index
    %1 = vector.load %arg2[%c0_1, %c0_2] : memref<2048x128xf32, #tpu.memory_space<vmem>>, vector<2048x128xf32>
    %cst = arith.constant dense<0.000000e+00> : vector<8x128xf32>
    %2 = tpu.matmul %0, %1, %cst {dimension_numbers = #tpu.dot_dimension_numbers<[1], [0], [0], [1], [0, 0, 1, 1], [], []>} : vector<8x2048xf32>, vector<2048x128xf32>, vector<8x128xf32> -> vector<8x128xf32>
    %c0_3 = arith.constant 0 : index
    %c0_4 = arith.constant 0 : index
    %3 = vector.load %arg3[%c0_3, %c0_4] : memref<1x128xf32, #tpu.memory_space<vmem>>, vector<1x128xf32>
    %4 = vector.broadcast %3 : vector<1x128xf32> to vector<8x128xf32>
    %5 = arith.addf %2, %4 : vector<8x128xf32>
    %c0_5 = arith.constant 0 : index
    %c0_6 = arith.constant 0 : index
    %6 = vector.load %arg4[%c0_5, %c0_6] : memref<8x128xf32, #tpu.memory_space<vmem>>, vector<8x128xf32>
    tpu.vector_store %arg4[%c0_5, %c0_6], %5 {strides = array<i32>} : memref<8x128xf32, #tpu.memory_space<vmem>>, vector<8x128xf32>,
    return
  }
  func.func @transform_0(%arg0: i32) -> (i32, i32) {
    %c0_i32 = arith.constant 0 : i32
    %c0_i32_0 = arith.constant 0 : i32
    return %arg0, %c0_i32 : i32, i32
  }
  func.func @transform_1(%arg0: i32) -> (i32, i32) {
    %c0_i32 = arith.constant 0 : i32
    %c0_i32_0 = arith.constant 0 : i32
    %c0_i32_1 = arith.constant 0 : i32
    return %c0_i32, %c0_i32_0 : i32, i32
  }
  func.func @transform_2(%arg0: i32) -> (i32, i32) {
    %c0_i32 = arith.constant 0 : i32
    %c0_i32_0 = arith.constant 0 : i32
    %c0_i32_1 = arith.constant 0 : i32
    return %c0_i32, %c0_i32_0 : i32, i32
  }
  func.func @transform_3(%arg0: i32) -> (i32, i32) {
    %c0_i32 = arith.constant 0 : i32
    %c0_i32_0 = arith.constant 0 : i32
    return %arg0, %c0_i32 : i32, i32
  }
}

</mosaic_0001>

<bundles_post_ra>
// kernel: tile.8
= control target key start
LH: loop header
LB: loop body
LE: loop exit
PB: predicated region body
PF: predicated region fallthrough
CT: control target
= control target key end

     0   :  { %s64_s0 = inlined_call_operand.vmem [shape: f32[2], index: 0, kind: input, shape index: {}]   ;;  %s65_s1 = inlined_call_operand.vmem [shape: f32[64,2], index: 1, kind: output, shape index: {}]  }
   0x1   :  { %v4_v0 = vld [vmem:[%s64_s0] ss:$0 sm:$0xff] }
   0x2   :  { %5 = vst [vmem:[%s65_s1] sm:$0xff] %v4_v0 }
   0x3   :  { %20 = vst [vmem:[%s65_s1 + $0x8] sm:$0xff] %v4_v0 }
   0x4   :  { %21 = vst [vmem:[%s65_s1 + $0x10] sm:$0xff] %v4_v0 }
   0x5   :  { %22 = vst [vmem:[%s65_s1 + $0x18] sm:$0xff] %v4_v0 }
   0x6   :  { %23 = vst [vmem:[%s65_s1 + $0x20] sm:$0xff] %v4_v0 }
   0x7   :  { %24 = vst [vmem:[%s65_s1 + $0x28] sm:$0xff] %v4_v0 }
   0x8   :  { %25 = vst [vmem:[%s65_s1 + $0x30] sm:$0xff] %v4_v0 }
   0x9   :  { %26 = vst [vmem:[%s65_s1 + $0x38] sm:$0xff] %v4_v0 }

// kernel: tile.9
= control target key start
LH: loop header
LB: loop body
LE: loop exit
PB: predicated region body
PF: predicated region fallthrough
CT: control target
= control target key end

     0   :  { %s515_s10 = smov 126   ;;  %s516_s11 = smov 122   ;;  %vm3_vm0 = vcmask 15360   ;;  %vm9_vm1 = vcmask 1048560   ;;  %vm15_vm2 = vcmask 1032160   ;;  %vm21_vm3 = vcmask 1015760   ;;  %s783_s0 = inlined_call_operand.vmem [shape: f32[64,2], index: 0, kind: input, shape index: {}]   ;;  %s784_s1 = inlined_call_operand.vmem [shape: f32[1,128], index: 1, kind: output, shape index: {}]  }
   0x1   :  { %v389_v0 = vld [vmem:[%s783_s0 + $0x3f] sm:$0x1]   ;;  %v391_v1 = vld [vmem:[%s783_s0 + $0x3d] sm:$0x1]   ;;  %v393_v2 = vld [vmem:[%s783_s0 + $0x3b] sm:$0x1]  }
   0x2   :  { %7 = vrot.lane.b32.xlu0 %v389_v0, %s515_s10  ;;  %19 = vrot.lane.b32.xlu1 %v391_v1, %s516_s11  ;;  %s517_s14 = smov 118   ;;  %v390_v3 = vld [vmem:[%s783_s0 + $0x3e] sm:$0x1]   ;;  %v392_v4 = vld [vmem:[%s783_s0 + $0x3c] sm:$0x1]   ;;  %s518_s19 = smov 124  }
   0x3   :  { %31 = vrot.lane.b32.xlu2 %v393_v2, %s517_s14  ;;  %s519_s20 = smov 120   ;;  %v394_v5 = vld [vmem:[%s783_s0 + $0x3a] sm:$0x1]   ;;  %s520_s23 = smov 116   ;;  %v395_v6 = vld [vmem:[%s783_s0 + $0x39] sm:$0x1]  }
   0x4   :  { %v396_v7 = vld [vmem:[%s783_s0 + $0x38] sm:$0x1]   ;;  %s521_s28 = smov 114   ;;  %s522_s29 = smov 112   ;;  %v397_v8 = vld [vmem:[%s783_s0 + $0x37] sm:$0x1]  }
   0x5   :  { %s523_s3 = smov 110   ;;  %v398_v9 = vld [vmem:[%s783_s0 + $0x36] sm:$0x1]   ;;  %v399_v10 = vld [vmem:[%s783_s0 + $0x35] sm:$0x1]   ;;  %s524_s8 = smov 108  }
   0x6   :  { %s525_s9 = smov 106   ;;  %v400_v11 = vld [vmem:[%s783_s0 + $0x34] sm:$0x1]   ;;  %s526_s12 = smov 104   ;;  %v401_v12 = vld [vmem:[%s783_s0 + $0x33] sm:$0x1]  }
   0x7   :  { %v402_v13 = vld [vmem:[%s783_s0 + $0x32] sm:$0x1]   ;;  %s527_s17 = smov 102   ;;  %s528_s18 = smov 100   ;;  %v403_v14 = vld [vmem:[%s783_s0 + $0x31] sm:$0x1]  }
   0x8   :  { %s529_s21 = smov 98   ;;  %v404_v15 = vld [vmem:[%s783_s0 + $0x30] sm:$0x1]   ;;  %v405_v16 = vld [vmem:[%s783_s0 + $0x2f] sm:$0x1]   ;;  %s530_s26 = smov 96  }
   0x9   :  { %s531_s27 = smov 94   ;;  %v406_v17 = vld [vmem:[%s783_s0 + $0x2e] sm:$0x1]   ;;  %s532_s30 = smov 92   ;;  %v407_v18 = vld [vmem:[%s783_s0 + $0x2d] sm:$0x1]  }
   0xa   :  { %13 = vrot.lane.b32.xlu0 %v390_v3, %s518_s19  ;;  %25 = vrot.lane.b32.xlu1 %v392_v4, %s519_s20  ;;  %v408_v19 = vld [vmem:[%s783_s0 + $0x2c] sm:$0x1]   ;;  %s533_s6 = smov 90   ;;  %s534_s7 = smov 88   ;;  %v409_v20 = vld [vmem:[%s783_s0 + $0x2b] sm:$0x1]  }
   0xb   :  { %37 = vrot.lane.b32.xlu2 %v394_v5, %s520_s23  ;;  %s535_s10 = smov 86   ;;  %v410_v21 = vld [vmem:[%s783_s0 + $0x2a] sm:$0x1]   ;;  %v411_v22 = vld [vmem:[%s783_s0 + $0x29] sm:$0x1]   ;;  %s536_s15 = smov 84  }
   0xc   :  { %s537_s16 = smov 82   ;;  %v412_v23 = vld [vmem:[%s783_s0 + $0x28] sm:$0x1]   ;;  %s538_s19 = smov 80   ;;  %v413_v24 = vld [vmem:[%s783_s0 + $0x27] sm:$0x1]  }
   0xd   :  { %v414_v25 = vld [vmem:[%s783_s0 + $0x26] sm:$0x1]   ;;  %s539_s24 = smov 78   ;;  %s540_s25 = smov 76   ;;  %v415_v26 = vld [vmem:[%s783_s0 + $0x25] sm:$0x1]  }
   0xe   :  { %v416_v27 = vld [vmem:[%s783_s0 + $0x24] sm:$0x1]   ;;  %v417_v28 = vld [vmem:[%s783_s0 + $0x23] sm:$0x1]   ;;  %s542_s4 = smov 72   ;;  %s543_s5 = smov 70  }
   0xf   :  { %v418_v29 = vld [vmem:[%s783_s0 + $0x22] sm:$0x1]   ;;  %v419_v30 = vld [vmem:[%s783_s0 + $0x21] sm:$0x1]   ;;  %v420_v31 = vld [vmem:[%s783_s0 + $0x20] sm:$0x1]  }
  0x10   :  { %s545_s13 = smov 66   ;;  %s546_s14 = smov 64   ;;  %v421_v32 = vld [vmem:[%s783_s0 + $0x1f] sm:$0x1]   ;;  %v2_v33 = vld [vmem:[%s783_s0] sm:$0x1]  }
  0x11   :  { %4 = vst.msk [vmem:[#allocation0] sm:$0x1] %vm3_vm0, %v2_v33   ;;  %v422_v34 = vld [vmem:[%s783_s0 + $0x1e] sm:$0x1]   ;;  %v423_v35 = vld [vmem:[%s783_s0 + $0x1d] sm:$0x1]  }
  0x12   :  { %43 = vrot.lane.b32.xlu0 %v395_v6, %s521_s28  ;;  %49 = vrot.lane.b32.xlu1 %v396_v7, %s522_s29  ;;  %s541_s28 = smov 74   ;;  %v424_v36 = vld [vmem:[%s783_s0 + $0x1c] sm:$0x1]   ;;  %v425_v37 = vld [vmem:[%s783_s0 + $0x1b] sm:$0x1]   ;;  %s557_s22 = smov 42  }
  0x13   :  { %55 = vrot.lane.b32.xlu2 %v397_v8, %s523_s3  ;;  %v426_v38 = vld [vmem:[%s783_s0 + $0x1a] sm:$0x1]   ;;  %v427_v40 = vld [vmem:[%s783_s0 + $0x19] sm:$0x1]   ;;  %v428_v41 = vld [vmem:[%s783_s0 + $0x18] sm:$0x1]  }
  0x14   :  { %v429_v42 = vld [vmem:[%s783_s0 + $0x17] sm:$0x1]   ;;  %v430_v44 = vld [vmem:[%s783_s0 + $0x16] sm:$0x1]   ;;  %v431_v45 = vld [vmem:[%s783_s0 + $0x15] sm:$0x1]  }
  0x15   :  { %v432_v46 = vld [vmem:[%s783_s0 + $0x14] sm:$0x1]   ;;  %s558_s23 = smov 40   ;;  %v433_v48 = vld [vmem:[%s783_s0 + $0x13] sm:$0x1]   ;;  %s560_s2 = smov 36  }
  0x16   :  { %v434_v51 = vld [vmem:[%s783_s0 + $0x12] sm:$0x1]   ;;  %v435_v52 = vld [vmem:[%s783_s0 + $0x11] sm:$0x1]   ;;  %s561_s3 = smov 34   ;;  %vm27_vm4 = vcmask 999360  }
  0x17   :  { %v436_v54 = vld [vmem:[%s783_s0 + $0x10] sm:$0x1]   ;;  %vm33_vm5 = vcmask 982960   ;;  %vm39_vm6 = vcmask 966560   ;;  %v437_v57 = vld [vmem:[%s783_s0 + $0xf] sm:$0x1]  }
  0x18   :  { %v438_v58 = vld [vmem:[%s783_s0 + $0xe] sm:$0x1]   ;;  %s563_s11 = smov 30   ;;  %vm45_vm7 = vcmask 950160   ;;  %vm51_vm8 = vcmask 933760   ;;  %vm57_vm9 = vcmask 917360  }
  0x19   :  { %v439_v60 = vld [vmem:[%s783_s0 + $0xd] sm:$0x1]   ;;  %v440_v63 = vld [vmem:[%s783_s0 + $0xc] sm:$0x1]   ;;  %v441_v0 = vld [vmem:[%s783_s0 + $0xb] sm:$0x1]  }
  0x1a   :  { %61 = vrot.lane.b32.xlu0 %v398_v9, %s524_s8  ;;  %67 = vrot.lane.b32.xlu1 %v399_v10, %s525_s9  ;;  %s544_s8 = smov 68   ;;  %s566_s20 = smov 24   ;;  %vm63_vm10 = vcmask 900960   ;;  %vm69_vm11 = vcmask 884560   ;;  %v442_v2 = vld [vmem:[%s783_s0 + $0xa] sm:$0x1]  }
  0x1b   :  { %73 = vrot.lane.b32.xlu2 %v400_v11, %s526_s12  ;;  %s564_s12 = smov 28   ;;  %vm75_vm12 = vcmask 868160   ;;  %v443_v5 = vld [vmem:[%s783_s0 + $0x9] sm:$0x1]   ;;  %v444_v6 = vld [vmem:[%s783_s0 + $0x8] sm:$0x1]  }
  0x1c   :  { %s569_s29 = smov 18   ;;  %vm81_vm13 = vcmask 851760   ;;  %vm87_vm14 = vcmask 835360   ;;  %v445_v8 = vld [vmem:[%s783_s0 + $0x7] sm:$0x1]   ;;  %vm93_vm15 = vcmask 818960  }
  0x1d   :  { %v446_v11 = vld [vmem:[%s783_s0 + $0x6] sm:$0x1]   ;;  %s572_s9 = smov 12   ;;  %vm99_vm0 = vcmask 802560  }
  0x22   :  { %79 = vrot.lane.b32.xlu0 %v401_v12, %s527_s17  ;;  %85 = vrot.lane.b32.xlu1 %v402_v13, %s528_s18  ;;  %s556_s17 = smov 44   ;;  %v447_v12 = vld [vmem:[%s783_s0 + $0x5] sm:$0x1]   ;;  %s575_s18 = smov 6  }
  0x23   :  { %91 = vrot.lane.b32.xlu2 %v403_v14, %s529_s21  ;;  %s567_s21 = smov 22   ;;  %v448_v14 = vld [vmem:[%s783_s0 + $0x4] sm:$0x1]  }
  0x2a   :  { %97 = vrot.lane.b32.xlu0 %v404_v15, %s530_s26  ;;  %103 = vrot.lane.b32.xlu1 %v405_v16, %s531_s27  ;;  %s559_s26 = smov 38  }
  0x2b   :  { %109 = vrot.lane.b32.xlu2 %v406_v17, %s532_s30  ;;  %s570_s30 = smov 16   ;;  %v449_v17 = vld [vmem:[%s783_s0 + $0x3] sm:$0x1]  }
  0x32   :  { %115 = vrot.lane.b32.xlu0 %v407_v18, %s533_s6  ;;  %121 = vrot.lane.b32.xlu1 %v408_v19, %s534_s7  ;;  %s562_s6 = smov 32   ;;  %v450_v18 = vld [vmem:[%s783_s0 + $0x2] sm:$0x1]  }
  0x33   :  { %127 = vrot.lane.b32.xlu2 %v409_v20, %s535_s10  ;;  %s573_s10 = smov 10   ;;  %v451_v20 = vld [vmem:[%s783_s0 + $0x1] sm:$0x1]   ;;  %s577_s0 = smov 2  }
  0x3a   :  { %133 = vrot.lane.b32.xlu0 %v410_v21, %s536_s15  ;;  %139 = vrot.lane.b32.xlu1 %v411_v22, %s537_s16  ;;  %s565_s15 = smov 26  }
  0x3b   :  { %145 = vrot.lane.b32.xlu2 %v412_v23, %s538_s19  ;;  %s547_s19 = smov 62  }
  0x42   :  { %151 = vrot.lane.b32.xlu0 %v413_v24, %s539_s24  ;;  %157 = vrot.lane.b32.xlu1 %v414_v25, %s540_s25  ;;  %s548_s24 = smov 60   ;;  %s549_s25 = smov 58  }
  0x43   :  { %163 = vrot.lane.b32.xlu2 %v415_v26, %s541_s28  ;;  %s550_s28 = smov 56  }
  0x4a   :  { %169 = vrot.lane.b32.xlu0 %v416_v27, %s542_s4  ;;  %175 = vrot.lane.b32.xlu1 %v417_v28, %s543_s5  ;;  %s551_s4 = smov 54   ;;  %s552_s5 = smov 52  }
  0x4b   :  { %181 = vrot.lane.b32.xlu2 %v418_v29, %s544_s8  ;;  %s553_s8 = smov 50  }
  0x52   :  { %187 = vrot.lane.b32.xlu0 %v419_v30, %s545_s13  ;;  %193 = vrot.lane.b32.xlu1 %v420_v31, %s546_s14  ;;  %s554_s13 = smov 48   ;;  %s555_s14 = smov 46  }
  0x53   :  { %199 = vrot.lane.b32.xlu2 %v421_v32, %s547_s19  ;;  %s576_s19 = smov 4  }
  0x5a   :  { %205 = vrot.lane.b32.xlu0 %v422_v34, %s548_s24  ;;  %211 = vrot.lane.b32.xlu1 %v423_v35, %s549_s25  ;;  %s568_s24 = smov 20  }
  0x5b   :  { %217 = vrot.lane.b32.xlu2 %v424_v36, %s550_s28 }
  0x5d   :  { %v32_v39 = vpop.permute.xlu2 %31  }
  0x62   :  { %223 = vrot.lane.b32.xlu0 %v425_v37, %s551_s4  ;;  %229 = vrot.lane.b32.xlu1 %v426_v38, %s552_s5  ;;  %s571_s4 = smov 14  }
  0x63   :  { %235 = vrot.lane.b32.xlu2 %v427_v40, %s553_s8 }
  0x65   :  { %v38_v43 = vpop.permute.xlu2 %37  }
  0x6a   :  { %241 = vrot.lane.b32.xlu0 %v428_v41, %s554_s13  ;;  %247 = vrot.lane.b32.xlu1 %v429_v42, %s555_s14  ;;  %s574_s13 = smov 8  }
  0x6b   :  { %253 = vrot.lane.b32.xlu2 %v430_v44, %s556_s17 }
  0x6d   :  { %v56_v47 = vpop.permute.xlu2 %55  }
  0x72   :  { %259 = vrot.lane.b32.xlu0 %v431_v45, %s557_s22  ;;  %265 = vrot.lane.b32.xlu1 %v432_v46, %s558_s23 }
  0x73   :  { %271 = vrot.lane.b32.xlu2 %v433_v48, %s559_s26 }
  0x74   :  { %v8_v49 = vpop.permute.xlu0 %7   ;;  %v20_v50 = vpop.permute.xlu1 %19  }
  0x75   :  { %10 = vst.msk [vmem:[#allocation0] sm:$0x1] %vm9_vm1, %v8_v49   ;;  %v74_v53 = vpop.permute.xlu2 %73   ;;  %vm105_vm1 = vcmask 786160  }
  0x7a   :  { %277 = vrot.lane.b32.xlu0 %v434_v51, %s560_s2  ;;  %283 = vrot.lane.b32.xlu1 %v435_v52, %s561_s3 }
  0x7b   :  { %289 = vrot.lane.b32.xlu2 %v436_v54, %s562_s6 }
  0x7c   :  { %v14_v55 = vpop.permute.xlu0 %13   ;;  %v26_v56 = vpop.permute.xlu1 %25  }
  0x7d   :  { %16 = vst.msk [vmem:[#allocation0] sm:$0x1] %vm15_vm2, %v14_v55   ;;  %v92_v59 = vpop.permute.xlu2 %91   ;;  %vm111_vm2 = vcmask 769760  }
  0x7e   :  { %22 = vst.msk [vmem:[#allocation0] sm:$0x1] %vm21_vm3, %v20_v50   ;;  %vm117_vm3 = vcmask 753360  }
  0x7f   :  { %28 = vst.msk [vmem:[#allocation0] sm:$0x1] %vm27_vm4, %v26_v56   ;;  %vm123_vm4 = vcmask 736960  }
  0x80   :  { %34 = vst.msk [vmem:[#allocation0] sm:$0x1] %vm33_vm5, %v32_v39   ;;  %vm129_vm5 = vcmask 720560  }
  0x81   :  { %40 = vst.msk [vmem:[#allocation0] sm:$0x1] %vm39_vm6, %v38_v43   ;;  %vm135_vm6 = vcmask 704160  }
  0x82   :  { %295 = vrot.lane.b32.xlu0 %v437_v57, %s563_s11  ;;  %301 = vrot.lane.b32.xlu1 %v438_v58, %s564_s12 }
  0x83   :  { %307 = vrot.lane.b32.xlu2 %v439_v60, %s565_s15 }
  0x84   :  { %v44_v61 = vpop.permute.xlu0 %43   ;;  %v50_v62 = vpop.permute.xlu1 %49  }
  0x85   :  { %46 = vst.msk [vmem:[#allocation0] sm:$0x1] %vm45_vm7, %v44_v61   ;;  %v110_v1 = vpop.permute.xlu2 %109   ;;  %vm141_vm7 = vcmask 687760  }
  0x86   :  { %52 = vst.msk [vmem:[#allocation0] sm:$0x1] %vm51_vm8, %v50_v62   ;;  %vm147_vm8 = vcmask 671360  }
  0x87   :  { %58 = vst.msk [vmem:[#allocation0] sm:$0x1] %vm57_vm9, %v56_v47   ;;  %vm153_vm9 = vcmask 654960  }
  0x8a   :  { %313 = vrot.lane.b32.xlu0 %v440_v63, %s566_s20  ;;  %319 = vrot.lane.b32.xlu1 %v441_v0, %s567_s21 }
  0x8b   :  { %325 = vrot.lane.b32.xlu2 %v442_v2, %s568_s24 }
  0x8c   :  { %v62_v3 = vpop.permute.xlu0 %61   ;;  %v68_v4 = vpop.permute.xlu1 %67  }
  0x8d   :  { %64 = vst.msk [vmem:[#allocation0] sm:$0x1] %vm63_vm10, %v62_v3   ;;  %v128_v7 = vpop.permute.xlu2 %127   ;;  %vm159_vm10 = vcmask 638560  }
  0x8e   :  { %70 = vst.msk [vmem:[#allocation0] sm:$0x1] %vm69_vm11, %v68_v4   ;;  %vm165_vm11 = vcmask 622160  }
  0x8f   :  { %76 = vst.msk [vmem:[#allocation0] sm:$0x1] %vm75_vm12, %v74_v53   ;;  %vm171_vm12 = vcmask 605760  }
  0x92   :  { %331 = vrot.lane.b32.xlu0 %v443_v5, %s569_s29  ;;  %337 = vrot.lane.b32.xlu1 %v444_v6, %s570_s30 }
  0x93   :  { %343 = vrot.lane.b32.xlu2 %v445_v8, %s571_s4 }
  0x94   :  { %v80_v9 = vpop.permute.xlu0 %79   ;;  %v86_v10 = vpop.permute.xlu1 %85  }
  0x95   :  { %82 = vst.msk [vmem:[#allocation0] sm:$0x1] %vm81_vm13, %v80_v9   ;;  %v146_v13 = vpop.permute.xlu2 %145   ;;  %vm177_vm13 = vcmask 589360  }
  0x96   :  { %88 = vst.msk [vmem:[#allocation0] sm:$0x1] %vm87_vm14, %v86_v10   ;;  %vm183_vm14 = vcmask 572960  }
  0x97   :  { %94 = vst.msk [vmem:[#allocation0] sm:$0x1] %vm93_vm15, %v92_v59   ;;  %vm189_vm15 = vcmask 556560  }
  0x9a   :  { %349 = vrot.lane.b32.xlu0 %v446_v11, %s572_s9  ;;  %355 = vrot.lane.b32.xlu1 %v447_v12, %s573_s10 }
  0x9b   :  { %361 = vrot.lane.b32.xlu2 %v448_v14, %s574_s13 }
  0x9c   :  { %v98_v15 = vpop.permute.xlu0 %97   ;;  %v104_v16 = vpop.permute.xlu1 %103  }
  0x9d   :  { %100 = vst.msk [vmem:[#allocation0] sm:$0x1] %vm99_vm0, %v98_v15   ;;  %v164_v19 = vpop.permute.xlu2 %163   ;;  %vm195_vm0 = vcmask 540160  }
  0x9e   :  { %106 = vst.msk [vmem:[#allocation0] sm:$0x1] %vm105_vm1, %v104_v16   ;;  %vm201_vm1 = vcmask 523760  }
  0x9f   :  { %112 = vst.msk [vmem:[#allocation0] sm:$0x1] %vm111_vm2, %v110_v1   ;;  %vm207_vm2 = vcmask 507360  }
  0xa2   :  { %367 = vrot.lane.b32.xlu0 %v449_v17, %s575_s18  ;;  %373 = vrot.lane.b32.xlu1 %v450_v18, %s576_s19 }
  0xa3   :  { %379 = vrot.lane.b32.xlu2 %v451_v20, %s577_s0 }
  0xa4   :  { %v116_v21 = vpop.permute.xlu0 %115   ;;  %v122_v22 = vpop.permute.xlu1 %121  }
  0xa5   :  { %118 = vst.msk [vmem:[#allocation0] sm:$0x1] %vm117_vm3, %v116_v21   ;;  %v182_v23 = vpop.permute.xlu2 %181   ;;  %vm213_vm3 = vcmask 490960  }
  0xa6   :  { %124 = vst.msk [vmem:[#allocation0] sm:$0x1] %vm123_vm4, %v122_v22   ;;  %vm219_vm4 = vcmask 474560  }
  0xa7   :  { %130 = vst.msk [vmem:[#allocation0] sm:$0x1] %vm129_vm5, %v128_v7   ;;  %vm225_vm5 = vcmask 458160  }
  0xac   :  { %v134_v24 = vpop.permute.xlu0 %133   ;;  %v140_v25 = vpop.permute.xlu1 %139  }
  0xad   :  { %136 = vst.msk [vmem:[#allocation0] sm:$0x1] %vm135_vm6, %v134_v24   ;;  %v200_v26 = vpop.permute.xlu2 %199   ;;  %vm231_vm6 = vcmask 441760  }
  0xae   :  { %142 = vst.msk [vmem:[#allocation0] sm:$0x1] %vm141_vm7, %v140_v25   ;;  %vm237_vm7 = vcmask 425360  }
  0xaf   :  { %148 = vst.msk [vmem:[#allocation0] sm:$0x1] %vm147_vm8, %v146_v13   ;;  %vm243_vm8 = vcmask 408960  }
  0xb4   :  { %v152_v27 = vpop.permute.xlu0 %151   ;;  %v158_v28 = vpop.permute.xlu1 %157  }
  0xb5   :  { %154 = vst.msk [vmem:[#allocation0] sm:$0x1] %vm153_vm9, %v152_v27   ;;  %v218_v29 = vpop.permute.xlu2 %217   ;;  %vm249_vm9 = vcmask 392560  }
  0xb6   :  { %160 = vst.msk [vmem:[#allocation0] sm:$0x1] %vm159_vm10, %v158_v28   ;;  %vm255_vm10 = vcmask 376160  }
  0xb7   :  { %166 = vst.msk [vmem:[#allocation0] sm:$0x1] %vm165_vm11, %v164_v19   ;;  %vm261_vm11 = vcmask 359760  }
  0xbc   :  { %v170_v30 = vpop.permute.xlu0 %169   ;;  %v176_v31 = vpop.permute.xlu1 %175  }
  0xbd   :  { %172 = vst.msk [vmem:[#allocation0] sm:$0x1] %vm171_vm12, %v170_v30   ;;  %v236_v32 = vpop.permute.xlu2 %235   ;;  %vm267_vm12 = vcmask 343360  }
  0xbe   :  { %178 = vst.msk [vmem:[#allocation0] sm:$0x1] %vm177_vm13, %v176_v31   ;;  %vm273_vm13 = vcmask 326960  }
  0xbf   :  { %184 = vst.msk [vmem:[#allocation0] sm:$0x1] %vm183_vm14, %v182_v23   ;;  %vm279_vm14 = vcmask 310560  }
  0xc4   :  { %v188_v33 = vpop.permute.xlu0 %187   ;;  %v194_v34 = vpop.permute.xlu1 %193  }
  0xc5   :  { %190 = vst.msk [vmem:[#allocation0] sm:$0x1] %vm189_vm15, %v188_v33   ;;  %v254_v35 = vpop.permute.xlu2 %253   ;;  %vm285_vm15 = vcmask 294160  }
  0xc6   :  { %196 = vst.msk [vmem:[#allocation0] sm:$0x1] %vm195_vm0, %v194_v34   ;;  %vm291_vm0 = vcmask 277760  }
  0xc7   :  { %202 = vst.msk [vmem:[#allocation0] sm:$0x1] %vm201_vm1, %v200_v26   ;;  %vm297_vm1 = vcmask 261360  }
  0xcc   :  { %v206_v36 = vpop.permute.xlu0 %205   ;;  %v212_v37 = vpop.permute.xlu1 %211  }
  0xcd   :  { %208 = vst.msk [vmem:[#allocation0] sm:$0x1] %vm207_vm2, %v206_v36   ;;  %v272_v38 = vpop.permute.xlu2 %271   ;;  %vm303_vm2 = vcmask 244960  }
  0xce   :  { %214 = vst.msk [vmem:[#allocation0] sm:$0x1] %vm213_vm3, %v212_v37   ;;  %vm309_vm3 = vcmask 228560  }
  0xcf   :  { %220 = vst.msk [vmem:[#allocation0] sm:$0x1] %vm219_vm4, %v218_v29   ;;  %vm315_vm4 = vcmask 212160  }
  0xd4   :  { %v224_v39 = vpop.permute.xlu0 %223   ;;  %v230_v40 = vpop.permute.xlu1 %229  }
  0xd5   :  { %226 = vst.msk [vmem:[#allocation0] sm:$0x1] %vm225_vm5, %v224_v39   ;;  %v290_v41 = vpop.permute.xlu2 %289   ;;  %vm321_vm5 = vcmask 195760  }
  0xd6   :  { %232 = vst.msk [vmem:[#allocation0] sm:$0x1] %vm231_vm6, %v230_v40   ;;  %vm327_vm6 = vcmask 179360  }
  0xd7   :  { %238 = vst.msk [vmem:[#allocation0] sm:$0x1] %vm237_vm7, %v236_v32   ;;  %vm333_vm7 = vcmask 162960  }
  0xdc   :  { %v242_v42 = vpop.permute.xlu0 %241   ;;  %v248_v43 = vpop.permute.xlu1 %247  }
  0xdd   :  { %244 = vst.msk [vmem:[#allocation0] sm:$0x1] %vm243_vm8, %v242_v42   ;;  %v308_v44 = vpop.permute.xlu2 %307   ;;  %vm339_vm8 = vcmask 146560  }
  0xde   :  { %250 = vst.msk [vmem:[#allocation0] sm:$0x1] %vm249_vm9, %v248_v43   ;;  %vm345_vm9 = vcmask 130160  }
  0xdf   :  { %256 = vst.msk [vmem:[#allocation0] sm:$0x1] %vm255_vm10, %v254_v35   ;;  %vm351_vm10 = vcmask 113760  }
  0xe4   :  { %v260_v45 = vpop.permute.xlu0 %259   ;;  %v266_v46 = vpop.permute.xlu1 %265  }
  0xe5   :  { %262 = vst.msk [vmem:[#allocation0] sm:$0x1] %vm261_vm11, %v260_v45   ;;  %v326_v47 = vpop.permute.xlu2 %325   ;;  %vm357_vm11 = vcmask 97360  }
  0xe6   :  { %268 = vst.msk [vmem:[#allocation0] sm:$0x1] %vm267_vm12, %v266_v46   ;;  %vm363_vm12 = vcmask 80960  }
  0xe7   :  { %274 = vst.msk [vmem:[#allocation0] sm:$0x1] %vm273_vm13, %v272_v38   ;;  %vm369_vm13 = vcmask 64560  }
  0xec   :  { %v278_v48 = vpop.permute.xlu0 %277   ;;  %v284_v49 = vpop.permute.xlu1 %283  }
  0xed   :  { %280 = vst.msk [vmem:[#allocation0] sm:$0x1] %vm279_vm14, %v278_v48   ;;  %v344_v50 = vpop.permute.xlu2 %343   ;;  %vm375_vm14 = vcmask 48160  }
  0xee   :  { %286 = vst.msk [vmem:[#allocation0] sm:$0x1] %vm285_vm15, %v284_v49   ;;  %vm381_vm15 = vcmask 31760  }
  0xef   :  { %292 = vst.msk [vmem:[#allocation0] sm:$0x1] %vm291_vm0, %v290_v41  }
  0xf4   :  { %v296_v51 = vpop.permute.xlu0 %295   ;;  %v302_v52 = vpop.permute.xlu1 %301  }
  0xf5   :  { %298 = vst.msk [vmem:[#allocation0] sm:$0x1] %vm297_vm1, %v296_v51   ;;  %v362_v53 = vpop.permute.xlu2 %361  }
  0xf6   :  { %304 = vst.msk [vmem:[#allocation0] sm:$0x1] %vm303_vm2, %v302_v52  }
  0xf7   :  { %310 = vst.msk [vmem:[#allocation0] sm:$0x1] %vm309_vm3, %v308_v44  }
  0xfc   :  { %v314_v54 = vpop.permute.xlu0 %313   ;;  %v320_v55 = vpop.permute.xlu1 %319  }
  0xfd   :  { %316 = vst.msk [vmem:[#allocation0] sm:$0x1] %vm315_vm4, %v314_v54   ;;  %v380_v56 = vpop.permute.xlu2 %379  }
  0xfe   :  { %322 = vst.msk [vmem:[#allocation0] sm:$0x1] %vm321_vm5, %v320_v55  }
  0xff   :  { %328 = vst.msk [vmem:[#allocation0] sm:$0x1] %vm327_vm6, %v326_v47  }
 0x104   :  { %v332_v57 = vpop.permute.xlu0 %331   ;;  %v338_v58 = vpop.permute.xlu1 %337  }
 0x105   :  { %334 = vst.msk [vmem:[#allocation0] sm:$0x1] %vm333_vm7, %v332_v57  }
 0x106   :  { %340 = vst.msk [vmem:[#allocation0] sm:$0x1] %vm339_vm8, %v338_v58  }
 0x107   :  { %346 = vst.msk [vmem:[#allocation0] sm:$0x1] %vm345_vm9, %v344_v50  }
 0x10c   :  { %v350_v59 = vpop.permute.xlu0 %349   ;;  %v356_v60 = vpop.permute.xlu1 %355  }
 0x10d   :  { %352 = vst.msk [vmem:[#allocation0] sm:$0x1] %vm351_vm10, %v350_v59  }
 0x10e   :  { %358 = vst.msk [vmem:[#allocation0] sm:$0x1] %vm357_vm11, %v356_v60  }
 0x10f   :  { %364 = vst.msk [vmem:[#allocation0] sm:$0x1] %vm363_vm12, %v362_v53  }
 0x114   :  { %v368_v61 = vpop.permute.xlu0 %367   ;;  %v374_v62 = vpop.permute.xlu1 %373  }
 0x115   :  { %370 = vst.msk [vmem:[#allocation0] sm:$0x1] %vm369_vm13, %v368_v61  }
 0x116   :  { %376 = vst.msk [vmem:[#allocation0] sm:$0x1] %vm375_vm14, %v374_v62  }
 0x117   :  { %382 = vst.msk [vmem:[#allocation0] sm:$0x1] %vm381_vm15, %v380_v56  }
 0x11e   :  { %v385_v63 = vld [vmem:[#allocation0] sm:$0x1] }
 0x11f   :  { %388 = vst [vmem:[%s784_s1] sm:$0x1] %v385_v63 }

// kernel: classifier_nn_forward.1
= control target key start
LH: loop header
LB: loop body
LE: loop exit
PB: predicated region body
PF: predicated region fallthrough
CT: control target
= control target key end

     0   :  { %s867_s12 = smov 0   ;;  %s1687_s0 = inlined_call_operand.vmem [shape: f32[15,2048], index: 0, kind: input, shape index: {}]   ;;  %s1688_s1 = inlined_call_operand.vmem [shape: f32[2048,128], index: 1, kind: input, shape index: {}]   ;;  %s1689_s2 = inlined_call_operand.vmem [shape: f32[1,128], index: 2, kind: input, shape index: {}]   ;;  %s1690_s3 = inlined_call_operand.vmem [shape: f32[15,128], index: 3, kind: output, shape index: {}]  }
   0x1 LB: > { %s819_s13 = sadd.s32 4294967295, %s845_s12   ;;  %p823_p0 = scmp.ge.s32.totalorder %s845_s12, 1  ;;  %s845_s12 = sphi %s867_s12, %s13_s12  }
   0x2   : > { %p137_p1 = scmp.lt.s32.totalorder %s845_s12, 3 }
   0x4   : > { %p138_p2 = pnand %p823_p0, %p137_p1 }
   0x5   : > { %p1177_p3 = scmp.lt.s32.totalorder (!%p138_p2), %s819_s13, 1 }
   0x6   : > { %141 = sbr.rel (%p138_p2) target bundleno = 283 (0x11b), region = 32 }
   0xb   : > { %v200_v0 = vld [vmem:[%s1688_s1 + $0x78] sm:$0xff]  ;;  %v199_v2 = vld [vmem:[%s1688_s1 + $0x70] sm:$0xff]  ;;  %v198_v6 = vld [vmem:[%s1688_s1 + $0x68] sm:$0xff]  ;;  %s1693_s13 = smov (!%p1177_p3, %s819_s13), 1 }
   0xc   : > { %v232_v1 = vld [vmem:[%s1688_s1 + $0x178] sm:$0xff]  ;;  %445 = vmatpush.msra.mxu0 %v200_v0  ;;  %v231_v4 = vld [vmem:[%s1688_s1 + $0x170] sm:$0xff]  ;;  %v230_v8 = vld [vmem:[%s1688_s1 + $0x168] sm:$0xff]  ;;  %s829_s22 = sshll.u32 %s1693_s13, 7 }
   0xd   : > { %485 = vmatpush.msra.mxu2 %v232_v1  ;;  %v216_v3 = vld [vmem:[%s1688_s1 + $0xf8] sm:$0xff]  ;;  %v215_v7 = vld [vmem:[%s1688_s1 + $0xf0] sm:$0xff]  ;;  %v214_v10 = vld [vmem:[%s1688_s1 + $0xe8] sm:$0xff]  ;;  %s1257_s10 = scalar_lea.vmem %s1687_s0, %s829_s22 }
   0xe   : > { %v248_v5 = vld [vmem:[%s1688_s1 + $0x1f8] sm:$0xff]  ;;  %465 = vmatpush.msra.mxu1 %v216_v3  ;;  %446 = vmatpush.msra.mxu0 %v199_v2  ;;  %v247_v9 = vld [vmem:[%s1688_s1 + $0x1f0] sm:$0xff]  ;;  %v197_v11 = vld [vmem:[%s1688_s1 + $0x60] sm:$0xff] }
   0xf   : > { %505 = vmatpush.msra.mxu3 %v248_v5  ;;  %486 = vmatpush.msra.mxu2 %v231_v4  ;;  %v229_v12 = vld [vmem:[%s1688_s1 + $0x160] sm:$0xff]  ;;  %v246_v13 = vld [vmem:[%s1688_s1 + $0x1e8] sm:$0xff]  ;;  %v196_v16 = vld [vmem:[%s1688_s1 + $0x58] sm:$0xff] }
  0x10   : > { %466 = vmatpush.msra.mxu1 %v215_v7  ;;  %447 = vmatpush.msra.mxu0 %v198_v6  ;;  %v213_v14 = vld [vmem:[%s1688_s1 + $0xe0] sm:$0xff]  ;;  %v228_v17 = vld [vmem:[%s1688_s1 + $0x158] sm:$0xff]  ;;  %v195_v20 = vld [vmem:[%s1688_s1 + $0x50] sm:$0xff] }
  0x11   : > { %506 = vmatpush.msra.mxu3 %v247_v9  ;;  %487 = vmatpush.msra.mxu2 %v230_v8  ;;  %v245_v15 = vld [vmem:[%s1688_s1 + $0x1e0] sm:$0xff]  ;;  %v212_v18 = vld [vmem:[%s1688_s1 + $0xd8] sm:$0xff]  ;;  %v227_v21 = vld [vmem:[%s1688_s1 + $0x150] sm:$0xff] }
  0x12   : > { %467 = vmatpush.msra.mxu1 %v214_v10  ;;  %448 = vmatpush.msra.mxu0 %v197_v11  ;;  %v244_v19 = vld [vmem:[%s1688_s1 + $0x1d8] sm:$0xff]  ;;  %v211_v22 = vld [vmem:[%s1688_s1 + $0xd0] sm:$0xff]  ;;  %v194_v24 = vld [vmem:[%s1688_s1 + $0x48] sm:$0xff] }
  0x13   : > { %507 = vmatpush.msra.mxu3 %v246_v13  ;;  %488 = vmatpush.msra.mxu2 %v229_v12  ;;  %v243_v23 = vld [vmem:[%s1688_s1 + $0x1d0] sm:$0xff]  ;;  %v226_v25 = vld [vmem:[%s1688_s1 + $0x148] sm:$0xff]  ;;  %v193_v28 = vld [vmem:[%s1688_s1 + $0x40] sm:$0xff] }
  0x14   : > { %468 = vmatpush.msra.mxu1 %v213_v14  ;;  %449 = vmatpush.msra.mxu0 %v196_v16  ;;  %v210_v26 = vld [vmem:[%s1688_s1 + $0xc8] sm:$0xff]  ;;  %v225_v29 = vld [vmem:[%s1688_s1 + $0x140] sm:$0xff]  ;;  %v192_v32 = vld [vmem:[%s1688_s1 + $0x38] sm:$0xff] }
  0x15   : > { %508 = vmatpush.msra.mxu3 %v245_v15  ;;  %489 = vmatpush.msra.mxu2 %v228_v17  ;;  %v242_v27 = vld [vmem:[%s1688_s1 + $0x1c8] sm:$0xff]  ;;  %v209_v30 = vld [vmem:[%s1688_s1 + $0xc0] sm:$0xff]  ;;  %v224_v33 = vld [vmem:[%s1688_s1 + $0x138] sm:$0xff] }
  0x16   : > { %469 = vmatpush.msra.mxu1 %v212_v18  ;;  %450 = vmatpush.msra.mxu0 %v195_v20  ;;  %v241_v31 = vld [vmem:[%s1688_s1 + $0x1c0] sm:$0xff]  ;;  %v208_v34 = vld [vmem:[%s1688_s1 + $0xb8] sm:$0xff]  ;;  %v191_v36 = vld [vmem:[%s1688_s1 + $0x30] sm:$0xff] }
  0x17   : > { %509 = vmatpush.msra.mxu3 %v244_v19  ;;  %490 = vmatpush.msra.mxu2 %v227_v21  ;;  %v240_v35 = vld [vmem:[%s1688_s1 + $0x1b8] sm:$0xff]  ;;  %v223_v37 = vld [vmem:[%s1688_s1 + $0x130] sm:$0xff]  ;;  %v190_v40 = vld [vmem:[%s1688_s1 + $0x28] sm:$0xff] }
  0x18   : > { %470 = vmatpush.msra.mxu1 %v211_v22  ;;  %451 = vmatpush.msra.mxu0 %v194_v24  ;;  %v207_v38 = vld [vmem:[%s1688_s1 + $0xb0] sm:$0xff]  ;;  %v222_v41 = vld [vmem:[%s1688_s1 + $0x128] sm:$0xff]  ;;  %v189_v44 = vld [vmem:[%s1688_s1 + $0x20] sm:$0xff] }
  0x19   : > { %510 = vmatpush.msra.mxu3 %v243_v23  ;;  %491 = vmatpush.msra.mxu2 %v226_v25  ;;  %v239_v39 = vld [vmem:[%s1688_s1 + $0x1b0] sm:$0xff]  ;;  %v206_v42 = vld [vmem:[%s1688_s1 + $0xa8] sm:$0xff]  ;;  %v221_v45 = vld [vmem:[%s1688_s1 + $0x120] sm:$0xff] }
  0x1a   : > { %471 = vmatpush.msra.mxu1 %v210_v26  ;;  %452 = vmatpush.msra.mxu0 %v193_v28  ;;  %v238_v43 = vld [vmem:[%s1688_s1 + $0x1a8] sm:$0xff]  ;;  %v205_v46 = vld [vmem:[%s1688_s1 + $0xa0] sm:$0xff]  ;;  %v188_v48 = vld [vmem:[%s1688_s1 + $0x18] sm:$0xff] }
  0x1b   : > { %511 = vmatpush.msra.mxu3 %v242_v27  ;;  %492 = vmatpush.msra.mxu2 %v225_v29  ;;  %v237_v47 = vld [vmem:[%s1688_s1 + $0x1a0] sm:$0xff]  ;;  %v220_v49 = vld [vmem:[%s1688_s1 + $0x118] sm:$0xff]  ;;  %v187_v52 = vld [vmem:[%s1688_s1 + $0x10] sm:$0xff] }
  0x1c   : > { %472 = vmatpush.msra.mxu1 %v209_v30  ;;  %453 = vmatpush.msra.mxu0 %v192_v32  ;;  %v204_v50 = vld [vmem:[%s1688_s1 + $0x98] sm:$0xff]  ;;  %v219_v53 = vld [vmem:[%s1688_s1 + $0x110] sm:$0xff]  ;;  %v186_v56 = vld [vmem:[%s1688_s1 + $0x8] sm:$0xff] }
  0x1d   : > { %512 = vmatpush.msra.mxu3 %v241_v31  ;;  %493 = vmatpush.msra.mxu2 %v224_v33  ;;  %v236_v51 = vld [vmem:[%s1688_s1 + $0x198] sm:$0xff]  ;;  %v203_v54 = vld [vmem:[%s1688_s1 + $0x90] sm:$0xff]  ;;  %v218_v57 = vld [vmem:[%s1688_s1 + $0x108] sm:$0xff] }
  0x1e   : > { %473 = vmatpush.msra.mxu1 %v208_v34  ;;  %454 = vmatpush.msra.mxu0 %v191_v36  ;;  %v235_v55 = vld [vmem:[%s1688_s1 + $0x190] sm:$0xff]  ;;  %v202_v58 = vld [vmem:[%s1688_s1 + $0x88] sm:$0xff]  ;;  %v185_v60 = vld [vmem:[%s1688_s1] sm:$0xff] }
  0x1f   : > { %513 = vmatpush.msra.mxu3 %v240_v35  ;;  %494 = vmatpush.msra.mxu2 %v223_v37  ;;  %v234_v59 = vld [vmem:[%s1688_s1 + $0x188] sm:$0xff]  ;;  %v217_v61 = vld [vmem:[%s1688_s1 + $0x100] sm:$0xff]  ;;  %v264_v62 = vld [vmem:[%s1688_s1 + $0x278] sm:$0xff] }
  0x20   : > { %474 = vmatpush.msra.mxu1 %v207_v38  ;;  %455 = vmatpush.msra.mxu0 %v190_v40  ;;  %v296_v63 = vld [vmem:[%s1688_s1 + $0x378] sm:$0xff]  ;;  %v201_v0 = vld [vmem:[%s1688_s1 + $0x80] sm:$0xff]  ;;  %v263_v2 = vld [vmem:[%s1688_s1 + $0x270] sm:$0xff] }
  0x21   : > { %514 = vmatpush.msra.mxu3 %v239_v39  ;;  %495 = vmatpush.msra.mxu2 %v222_v41  ;;  %v233_v1 = vld [vmem:[%s1688_s1 + $0x180] sm:$0xff]  ;;  %v280_v3 = vld [vmem:[%s1688_s1 + $0x2f8] sm:$0xff]  ;;  %v295_v4 = vld [vmem:[%s1688_s1 + $0x370] sm:$0xff] }
  0x22   : > { %475 = vmatpush.msra.mxu1 %v206_v42  ;;  %456 = vmatpush.msra.mxu0 %v189_v44  ;;  %v312_v5 = vld [vmem:[%s1688_s1 + $0x3f8] sm:$0xff]  ;;  %v262_v6 = vld [vmem:[%s1688_s1 + $0x268] sm:$0xff]  ;;  %v279_v7 = vld [vmem:[%s1688_s1 + $0x2f0] sm:$0xff] }
  0x23   : > { %515 = vmatpush.msra.mxu3 %v238_v43  ;;  %496 = vmatpush.msra.mxu2 %v221_v45  ;;  %v294_v8 = vld [vmem:[%s1688_s1 + $0x368] sm:$0xff]  ;;  %v311_v9 = vld [vmem:[%s1688_s1 + $0x3f0] sm:$0xff]  ;;  %v261_v10 = vld [vmem:[%s1688_s1 + $0x260] sm:$0xff] }
  0x24   : > { %476 = vmatpush.msra.mxu1 %v205_v46  ;;  %457 = vmatpush.msra.mxu0 %v188_v48  ;;  %v278_v11 = vld [vmem:[%s1688_s1 + $0x2e8] sm:$0xff]  ;;  %v293_v12 = vld [vmem:[%s1688_s1 + $0x360] sm:$0xff]  ;;  %v260_v14 = vld [vmem:[%s1688_s1 + $0x258] sm:$0xff] }
  0x25   : > { %516 = vmatpush.msra.mxu3 %v237_v47  ;;  %497 = vmatpush.msra.mxu2 %v220_v49  ;;  %v310_v13 = vld [vmem:[%s1688_s1 + $0x3e8] sm:$0xff]  ;;  %v277_v15 = vld [vmem:[%s1688_s1 + $0x2e0] sm:$0xff]  ;;  %v292_v16 = vld [vmem:[%s1688_s1 + $0x358] sm:$0xff] }
  0x26   : > { %477 = vmatpush.msra.mxu1 %v204_v50  ;;  %458 = vmatpush.msra.mxu0 %v187_v52  ;;  %v309_v17 = vld [vmem:[%s1688_s1 + $0x3e0] sm:$0xff]  ;;  %v259_v18 = vld [vmem:[%s1688_s1 + $0x250] sm:$0xff]  ;;  %v276_v19 = vld [vmem:[%s1688_s1 + $0x2d8] sm:$0xff] }
  0x27   : > { %517 = vmatpush.msra.mxu3 %v236_v51  ;;  %498 = vmatpush.msra.mxu2 %v219_v53  ;;  %v291_v20 = vld [vmem:[%s1688_s1 + $0x350] sm:$0xff]  ;;  %v308_v21 = vld [vmem:[%s1688_s1 + $0x3d8] sm:$0xff]  ;;  %v258_v22 = vld [vmem:[%s1688_s1 + $0x248] sm:$0xff] }
  0x28   : > { %478 = vmatpush.msra.mxu1 %v203_v54  ;;  %459 = vmatpush.msra.mxu0 %v186_v56  ;;  %v275_v23 = vld [vmem:[%s1688_s1 + $0x2d0] sm:$0xff]  ;;  %v290_v24 = vld [vmem:[%s1688_s1 + $0x348] sm:$0xff]  ;;  %v257_v26 = vld [vmem:[%s1688_s1 + $0x240] sm:$0xff] }
  0x29   : > { %518 = vmatpush.msra.mxu3 %v235_v55  ;;  %499 = vmatpush.msra.mxu2 %v218_v57  ;;  %v307_v25 = vld [vmem:[%s1688_s1 + $0x3d0] sm:$0xff]  ;;  %v274_v27 = vld [vmem:[%s1688_s1 + $0x2c8] sm:$0xff]  ;;  %v289_v28 = vld [vmem:[%s1688_s1 + $0x340] sm:$0xff] }
  0x2a   : > { %479 = vmatpush.msra.mxu1 %v202_v58  ;;  %460 = vmatpush.msra.mxu0 %v185_v60  ;;  %v306_v29 = vld [vmem:[%s1688_s1 + $0x3c8] sm:$0xff]  ;;  %v256_v30 = vld [vmem:[%s1688_s1 + $0x238] sm:$0xff]  ;;  %v273_v31 = vld [vmem:[%s1688_s1 + $0x2c0] sm:$0xff] }
  0x2b   : > { %519 = vmatpush.msra.mxu3 %v234_v59  ;;  %500 = vmatpush.msra.mxu2 %v217_v61  ;;  %v288_v32 = vld [vmem:[%s1688_s1 + $0x338] sm:$0xff]  ;;  %v305_v33 = vld [vmem:[%s1688_s1 + $0x3c0] sm:$0xff]  ;;  %v255_v34 = vld [vmem:[%s1688_s1 + $0x230] sm:$0xff] }
  0x2c   : > { %525 = vmatpush.msrb.mxu0 %v264_v62  ;;  %480 = vmatpush.msra.mxu1 %v201_v0  ;;  %v272_v35 = vld [vmem:[%s1688_s1 + $0x2b8] sm:$0xff]  ;;  %v287_v36 = vld [vmem:[%s1688_s1 + $0x330] sm:$0xff]  ;;  %v254_v38 = vld [vmem:[%s1688_s1 + $0x228] sm:$0xff] }
  0x2d   : > { %565 = vmatpush.msrb.mxu2 %v296_v63  ;;  %520 = vmatpush.msra.mxu3 %v233_v1  ;;  %v304_v37 = vld [vmem:[%s1688_s1 + $0x3b8] sm:$0xff]  ;;  %v271_v39 = vld [vmem:[%s1688_s1 + $0x2b0] sm:$0xff]  ;;  %v286_v40 = vld [vmem:[%s1688_s1 + $0x328] sm:$0xff] }
  0x2e   : > { %526 = vmatpush.msrb.mxu0 %v263_v2  ;;  %545 = vmatpush.msrb.mxu1 %v280_v3  ;;  %v303_v41 = vld [vmem:[%s1688_s1 + $0x3b0] sm:$0xff]  ;;  %v253_v42 = vld [vmem:[%s1688_s1 + $0x220] sm:$0xff]  ;;  %v270_v43 = vld [vmem:[%s1688_s1 + $0x2a8] sm:$0xff] }
  0x2f   : > { %566 = vmatpush.msrb.mxu2 %v295_v4  ;;  %585 = vmatpush.msrb.mxu3 %v312_v5  ;;  %v285_v44 = vld [vmem:[%s1688_s1 + $0x320] sm:$0xff]  ;;  %v302_v45 = vld [vmem:[%s1688_s1 + $0x3a8] sm:$0xff]  ;;  %v252_v46 = vld [vmem:[%s1688_s1 + $0x218] sm:$0xff] }
  0x30   : > { %527 = vmatpush.msrb.mxu0 %v262_v6  ;;  %546 = vmatpush.msrb.mxu1 %v279_v7  ;;  %v269_v47 = vld [vmem:[%s1688_s1 + $0x2a0] sm:$0xff]  ;;  %v284_v48 = vld [vmem:[%s1688_s1 + $0x318] sm:$0xff]  ;;  %v251_v50 = vld [vmem:[%s1688_s1 + $0x210] sm:$0xff] }
  0x31   : > { %567 = vmatpush.msrb.mxu2 %v294_v8  ;;  %586 = vmatpush.msrb.mxu3 %v311_v9  ;;  %v301_v49 = vld [vmem:[%s1688_s1 + $0x3a0] sm:$0xff]  ;;  %v268_v51 = vld [vmem:[%s1688_s1 + $0x298] sm:$0xff]  ;;  %v283_v52 = vld [vmem:[%s1688_s1 + $0x310] sm:$0xff] }
  0x32   : > { %528 = vmatpush.msrb.mxu0 %v261_v10  ;;  %547 = vmatpush.msrb.mxu1 %v278_v11  ;;  %v300_v53 = vld [vmem:[%s1688_s1 + $0x398] sm:$0xff]  ;;  %v250_v54 = vld [vmem:[%s1688_s1 + $0x208] sm:$0xff]  ;;  %v267_v55 = vld [vmem:[%s1688_s1 + $0x290] sm:$0xff] }
  0x33   : > { %568 = vmatpush.msrb.mxu2 %v293_v12  ;;  %587 = vmatpush.msrb.mxu3 %v310_v13  ;;  %v282_v56 = vld [vmem:[%s1688_s1 + $0x308] sm:$0xff]  ;;  %v299_v57 = vld [vmem:[%s1688_s1 + $0x390] sm:$0xff]  ;;  %v249_v58 = vld [vmem:[%s1688_s1 + $0x200] sm:$0xff] }
  0x34   : > { %529 = vmatpush.msrb.mxu0 %v260_v14  ;;  %548 = vmatpush.msrb.mxu1 %v277_v15  ;;  %v266_v59 = vld [vmem:[%s1688_s1 + $0x288] sm:$0xff]  ;;  %v281_v60 = vld [vmem:[%s1688_s1 + $0x300] sm:$0xff]  ;;  %v171_v63 = vld [vmem:[%s1257_s10 + $0x10] sm:$0xff] }
  0x35   : > { %569 = vmatpush.msrb.mxu2 %v292_v16  ;;  %588 = vmatpush.msrb.mxu3 %v309_v17  ;;  %v298_v61 = vld [vmem:[%s1688_s1 + $0x388] sm:$0xff]  ;;  %v169_v62 = vld [vmem:[%s1257_s10] sm:$0xff]  ;;  %v328_v0 = vld [vmem:[%s1688_s1 + $0x478] sm:$0xff] }
  0x36   : > { %530 = vmatpush.msrb.mxu0 %v259_v18  ;;  %549 = vmatpush.msrb.mxu1 %v276_v19  ;;  %v360_v1 = vld [vmem:[%s1688_s1 + $0x578] sm:$0xff]  ;;  %v265_v2 = vld [vmem:[%s1688_s1 + $0x280] sm:$0xff]  ;;  %v170_v4 = vld [vmem:[%s1257_s10 + $0x8] sm:$0xff] }
  0x37   : > { %570 = vmatpush.msrb.mxu2 %v291_v20  ;;  %589 = vmatpush.msrb.mxu3 %v308_v21  ;;  %v297_v3 = vld [vmem:[%s1688_s1 + $0x380] sm:$0xff]  ;;  %v172_v5 = vld [vmem:[%s1257_s10 + $0x18] sm:$0xff]  ;;  %v327_v6 = vld [vmem:[%s1688_s1 + $0x470] sm:$0xff] }
  0x38   : > { %531 = vmatpush.msrb.mxu0 %v258_v22  ;;  %550 = vmatpush.msrb.mxu1 %v275_v23  ;;  %v344_v7 = vld [vmem:[%s1688_s1 + $0x4f8] sm:$0xff]  ;;  %v359_v8 = vld [vmem:[%s1688_s1 + $0x570] sm:$0xff]  ;;  %v326_v10 = vld [vmem:[%s1688_s1 + $0x468] sm:$0xff] }
  0x39   : > { %571 = vmatpush.msrb.mxu2 %v290_v24  ;;  %590 = vmatpush.msrb.mxu3 %v307_v25  ;;  %v376_v9 = vld [vmem:[%s1688_s1 + $0x5f8] sm:$0xff]  ;;  %v343_v11 = vld [vmem:[%s1688_s1 + $0x4f0] sm:$0xff]  ;;  %v358_v12 = vld [vmem:[%s1688_s1 + $0x568] sm:$0xff] }
  0x3a   : > { %532 = vmatpush.msrb.mxu0 %v257_v26  ;;  %551 = vmatpush.msrb.mxu1 %v274_v27  ;;  %v375_v13 = vld [vmem:[%s1688_s1 + $0x5f0] sm:$0xff]  ;;  %v325_v14 = vld [vmem:[%s1688_s1 + $0x460] sm:$0xff]  ;;  %v342_v15 = vld [vmem:[%s1688_s1 + $0x4e8] sm:$0xff] }
  0x3b   : > { %572 = vmatpush.msrb.mxu2 %v289_v28  ;;  %591 = vmatpush.msrb.mxu3 %v306_v29  ;;  %v357_v16 = vld [vmem:[%s1688_s1 + $0x560] sm:$0xff]  ;;  %v374_v17 = vld [vmem:[%s1688_s1 + $0x5e8] sm:$0xff]  ;;  %v175_v18 = vld [vmem:[%s1257_s10 + $0x30] sm:$0xff] }
  0x3c   : > { %533 = vmatpush.msrb.mxu0 %v256_v30  ;;  %552 = vmatpush.msrb.mxu1 %v273_v31  ;;  %v324_v19 = vld [vmem:[%s1688_s1 + $0x458] sm:$0xff]  ;;  %v341_v20 = vld [vmem:[%s1688_s1 + $0x4e0] sm:$0xff]  ;;  %v323_v25 = vld [vmem:[%s1688_s1 + $0x450] sm:$0xff] }
  0x3d   : > { %573 = vmatpush.msrb.mxu2 %v288_v32  ;;  %592 = vmatpush.msrb.mxu3 %v305_v33  ;;  %v356_v21 = vld [vmem:[%s1688_s1 + $0x558] sm:$0xff]  ;;  %v373_v22 = vld [vmem:[%s1688_s1 + $0x5e0] sm:$0xff]  ;;  %v355_v27 = vld [vmem:[%s1688_s1 + $0x550] sm:$0xff] }
  0x3e   : > { %534 = vmatpush.msrb.mxu0 %v255_v34  ;;  %553 = vmatpush.msrb.mxu1 %v272_v35  ;;  %v173_v23 = vld [vmem:[%s1257_s10 + $0x20] sm:$0xff]  ;;  %v176_v24 = vld [vmem:[%s1257_s10 + $0x38] sm:$0xff]  ;;  %v174_v29 = vld [vmem:[%s1257_s10 + $0x28] sm:$0xff] }
  0x3f   : > { %574 = vmatpush.msrb.mxu2 %v287_v36  ;;  %593 = vmatpush.msrb.mxu3 %v304_v37  ;;  %v340_v26 = vld [vmem:[%s1688_s1 + $0x4d8] sm:$0xff]  ;;  %v322_v30 = vld [vmem:[%s1688_s1 + $0x448] sm:$0xff]  ;;  %v339_v31 = vld [vmem:[%s1688_s1 + $0x4d0] sm:$0xff] }
  0x40   : > { %535 = vmatpush.msrb.mxu0 %v254_v38  ;;  %554 = vmatpush.msrb.mxu1 %v271_v39  ;;  %v372_v28 = vld [vmem:[%s1688_s1 + $0x5d8] sm:$0xff]  ;;  %v354_v32 = vld [vmem:[%s1688_s1 + $0x548] sm:$0xff]  ;;  %v371_v33 = vld [vmem:[%s1688_s1 + $0x5d0] sm:$0xff] }
  0x41   : > { %575 = vmatpush.msrb.mxu2 %v286_v40  ;;  %594 = vmatpush.msrb.mxu3 %v303_v41  ;;  %v321_v34 = vld [vmem:[%s1688_s1 + $0x440] sm:$0xff]  ;;  %v338_v35 = vld [vmem:[%s1688_s1 + $0x4c8] sm:$0xff]  ;;  %v320_v38 = vld [vmem:[%s1688_s1 + $0x438] sm:$0xff] }
  0x42   : > { %536 = vmatpush.msrb.mxu0 %v253_v42  ;;  %555 = vmatpush.msrb.mxu1 %v270_v43  ;;  %v353_v36 = vld [vmem:[%s1688_s1 + $0x540] sm:$0xff]  ;;  %v370_v37 = vld [vmem:[%s1688_s1 + $0x5c8] sm:$0xff]  ;;  %v352_v40 = vld [vmem:[%s1688_s1 + $0x538] sm:$0xff] }
  0x43   : > { %576 = vmatpush.msrb.mxu2 %v285_v44  ;;  %595 = vmatpush.msrb.mxu3 %v302_v45  ;;  %v337_v39 = vld [vmem:[%s1688_s1 + $0x4c0] sm:$0xff]  ;;  %v319_v42 = vld [vmem:[%s1688_s1 + $0x430] sm:$0xff]  ;;  %v336_v43 = vld [vmem:[%s1688_s1 + $0x4b8] sm:$0xff] }
  0x44   : > { %537 = vmatpush.msrb.mxu0 %v252_v46  ;;  %556 = vmatpush.msrb.mxu1 %v269_v47  ;;  %v369_v41 = vld [vmem:[%s1688_s1 + $0x5c0] sm:$0xff]  ;;  %v351_v44 = vld [vmem:[%s1688_s1 + $0x530] sm:$0xff]  ;;  %v368_v45 = vld [vmem:[%s1688_s1 + $0x5b8] sm:$0xff] }
  0x45   : > { %577 = vmatpush.msrb.mxu2 %v284_v48  ;;  %596 = vmatpush.msrb.mxu3 %v301_v49  ;;  %v318_v46 = vld [vmem:[%s1688_s1 + $0x428] sm:$0xff]  ;;  %v335_v47 = vld [vmem:[%s1688_s1 + $0x4b0] sm:$0xff] }
  0x46   : > { %538 = vmatpush.msrb.mxu0 %v251_v50  ;;  %557 = vmatpush.msrb.mxu1 %v268_v51  ;;  %v350_v48 = vld [vmem:[%s1688_s1 + $0x528] sm:$0xff]  ;;  %v367_v49 = vld [vmem:[%s1688_s1 + $0x5b0] sm:$0xff]  ;;  %v317_v50 = vld [vmem:[%s1688_s1 + $0x420] sm:$0xff] }
  0x47   : > { %578 = vmatpush.msrb.mxu2 %v283_v52  ;;  %597 = vmatpush.msrb.mxu3 %v300_v53  ;;  %v334_v51 = vld [vmem:[%s1688_s1 + $0x4a8] sm:$0xff]  ;;  %v349_v52 = vld [vmem:[%s1688_s1 + $0x520] sm:$0xff] }
  0x48   : > { %539 = vmatpush.msrb.mxu0 %v250_v54  ;;  %558 = vmatpush.msrb.mxu1 %v267_v55  ;;  %v366_v53 = vld [vmem:[%s1688_s1 + $0x5a8] sm:$0xff]  ;;  %v316_v54 = vld [vmem:[%s1688_s1 + $0x418] sm:$0xff]  ;;  %v333_v55 = vld [vmem:[%s1688_s1 + $0x4a0] sm:$0xff] }
  0x49   : > { %579 = vmatpush.msrb.mxu2 %v282_v56  ;;  %598 = vmatpush.msrb.mxu3 %v299_v57  ;;  %v348_v56 = vld [vmem:[%s1688_s1 + $0x518] sm:$0xff]  ;;  %v365_v57 = vld [vmem:[%s1688_s1 + $0x5a0] sm:$0xff] }
  0x4a   : > { %540 = vmatpush.msrb.mxu0 %v249_v58  ;;  %559 = vmatpush.msrb.mxu1 %v266_v59  ;;  %v315_v58 = vld [vmem:[%s1688_s1 + $0x410] sm:$0xff]  ;;  %v332_v59 = vld [vmem:[%s1688_s1 + $0x498] sm:$0xff] }
  0x4b   : > { %580 = vmatpush.msrb.mxu2 %v281_v60  ;;  %599 = vmatpush.msrb.mxu3 %v298_v61  ;;  %v347_v60 = vld [vmem:[%s1688_s1 + $0x510] sm:$0xff]  ;;  %v364_v61 = vld [vmem:[%s1688_s1 + $0x598] sm:$0xff] }
  0x4c   : > { %461 = vmatmul.f32.vlgmr.msra.gmra.mxu0 %v169_v62  ;;  %501 = vmatmul.f32.vlgmr.msra.gmra.mxu2 %v171_v63  ;;  %v314_v62 = vld [vmem:[%s1688_s1 + $0x408] sm:$0xff]  ;;  %v331_v63 = vld [vmem:[%s1688_s1 + $0x490] sm:$0xff] }
  0x4d   : > { %605 = vmatpush.msra.mxu0 %v328_v0  ;;  %645 = vmatpush.msra.mxu2 %v360_v1  ;;  %v346_v0 = vld [vmem:[%s1688_s1 + $0x508] sm:$0xff]  ;;  %v363_v1 = vld [vmem:[%s1688_s1 + $0x590] sm:$0xff] }
  0x4e   : > { %560 = vmatpush.msrb.mxu1 %v265_v2  ;;  %600 = vmatpush.msrb.mxu3 %v297_v3  ;;  %v313_v2 = vld [vmem:[%s1688_s1 + $0x400] sm:$0xff]  ;;  %v330_v3 = vld [vmem:[%s1688_s1 + $0x488] sm:$0xff] }
  0x4f   : > { %481 = vmatmul.f32.vlgmr.msra.gmra.mxu1 %v170_v4  ;;  %521 = vmatmul.f32.vlgmr.msra.gmra.mxu3 %v172_v5  ;;  %v345_v4 = vld [vmem:[%s1688_s1 + $0x500] sm:$0xff]  ;;  %v362_v5 = vld [vmem:[%s1688_s1 + $0x588] sm:$0xff] }
  0x50   : > { %606 = vmatpush.msra.mxu0 %v327_v6  ;;  %625 = vmatpush.msra.mxu1 %v344_v7  ;;  %v177_v6 = vld [vmem:[%s1257_s10 + $0x40] sm:$0xff]  ;;  %v179_v7 = vld [vmem:[%s1257_s10 + $0x50] sm:$0xff] }
  0x51   : > { %646 = vmatpush.msra.mxu2 %v359_v8  ;;  %665 = vmatpush.msra.mxu3 %v376_v9  ;;  %v392_v8 = vld [vmem:[%s1688_s1 + $0x678] sm:$0xff] }
  0x52   : > { %607 = vmatpush.msra.mxu0 %v326_v10  ;;  %626 = vmatpush.msra.mxu1 %v343_v11  ;;  %v424_v9 = vld [vmem:[%s1688_s1 + $0x778] sm:$0xff]  ;;  %v329_v10 = vld [vmem:[%s1688_s1 + $0x480] sm:$0xff] }
  0x53   : > { %647 = vmatpush.msra.mxu2 %v358_v12  ;;  %666 = vmatpush.msra.mxu3 %v375_v13  ;;  %v361_v11 = vld [vmem:[%s1688_s1 + $0x580] sm:$0xff]  ;;  %v178_v12 = vld [vmem:[%s1257_s10 + $0x48] sm:$0xff]  ;;  %v180_v13 = vld [vmem:[%s1257_s10 + $0x58] sm:$0xff] }
  0x54   : > { %608 = vmatpush.msra.mxu0 %v325_v14  ;;  %627 = vmatpush.msra.mxu1 %v342_v15  ;;  %v391_v14 = vld [vmem:[%s1688_s1 + $0x670] sm:$0xff]  ;;  %v408_v15 = vld [vmem:[%s1688_s1 + $0x6f8] sm:$0xff] }
  0x55   : > { %648 = vmatpush.msra.mxu2 %v357_v16  ;;  %667 = vmatpush.msra.mxu3 %v374_v17  ;;  %v423_v16 = vld [vmem:[%s1688_s1 + $0x770] sm:$0xff]  ;;  %v440_v17 = vld [vmem:[%s1688_s1 + $0x7f8] sm:$0xff] }
  0x56   : > { %581 = vmatmul.f32.vlgmr.msrb.gmra.mxu2 %v175_v18  ;;  %609 = vmatpush.msra.mxu0 %v324_v19  ;;  %v390_v18 = vld [vmem:[%s1688_s1 + $0x668] sm:$0xff]  ;;  %v407_v19 = vld [vmem:[%s1688_s1 + $0x6f0] sm:$0xff] }
  0x57   : > { %628 = vmatpush.msra.mxu1 %v341_v20  ;;  %649 = vmatpush.msra.mxu2 %v356_v21  ;;  %v422_v20 = vld [vmem:[%s1688_s1 + $0x768] sm:$0xff]  ;;  %v439_v21 = vld [vmem:[%s1688_s1 + $0x7f0] sm:$0xff] }
  0x58   : > { %668 = vmatpush.msra.mxu3 %v373_v22  ;;  %541 = vmatmul.f32.vlgmr.msrb.gmra.mxu0 %v173_v23  ;;  %v389_v22 = vld [vmem:[%s1688_s1 + $0x660] sm:$0xff]  ;;  %v406_v23 = vld [vmem:[%s1688_s1 + $0x6e8] sm:$0xff] }
  0x59   : > { %601 = vmatmul.f32.vlgmr.msrb.gmra.mxu3 %v176_v24  ;;  %610 = vmatpush.msra.mxu0 %v323_v25  ;;  %v421_v24 = vld [vmem:[%s1688_s1 + $0x760] sm:$0xff]  ;;  %v438_v25 = vld [vmem:[%s1688_s1 + $0x7e8] sm:$0xff] }
  0x5a   : > { %629 = vmatpush.msra.mxu1 %v340_v26  ;;  %650 = vmatpush.msra.mxu2 %v355_v27  ;;  %v388_v26 = vld [vmem:[%s1688_s1 + $0x658] sm:$0xff]  ;;  %v405_v27 = vld [vmem:[%s1688_s1 + $0x6e0] sm:$0xff] }
  0x5b   : > { %669 = vmatpush.msra.mxu3 %v372_v28  ;;  %561 = vmatmul.f32.vlgmr.msrb.gmra.mxu1 %v174_v29  ;;  %v420_v28 = vld [vmem:[%s1688_s1 + $0x758] sm:$0xff]  ;;  %v437_v29 = vld [vmem:[%s1688_s1 + $0x7e0] sm:$0xff] }
  0x5c   : > { %611 = vmatpush.msra.mxu0 %v322_v30  ;;  %630 = vmatpush.msra.mxu1 %v339_v31  ;;  %v387_v30 = vld [vmem:[%s1688_s1 + $0x650] sm:$0xff]  ;;  %v404_v31 = vld [vmem:[%s1688_s1 + $0x6d8] sm:$0xff] }
  0x5d   : > { %651 = vmatpush.msra.mxu2 %v354_v32  ;;  %670 = vmatpush.msra.mxu3 %v371_v33  ;;  %v419_v32 = vld [vmem:[%s1688_s1 + $0x750] sm:$0xff]  ;;  %v436_v33 = vld [vmem:[%s1688_s1 + $0x7d8] sm:$0xff] }
  0x5e   : > { %612 = vmatpush.msra.mxu0 %v321_v34  ;;  %631 = vmatpush.msra.mxu1 %v338_v35  ;;  %v386_v34 = vld [vmem:[%s1688_s1 + $0x648] sm:$0xff]  ;;  %v403_v35 = vld [vmem:[%s1688_s1 + $0x6d0] sm:$0xff] }
  0x5f   : > { %652 = vmatpush.msra.mxu2 %v353_v36  ;;  %671 = vmatpush.msra.mxu3 %v370_v37  ;;  %v418_v36 = vld [vmem:[%s1688_s1 + $0x748] sm:$0xff]  ;;  %v435_v37 = vld [vmem:[%s1688_s1 + $0x7d0] sm:$0xff] }
  0x60   : > { %613 = vmatpush.msra.mxu0 %v320_v38  ;;  %632 = vmatpush.msra.mxu1 %v337_v39  ;;  %v385_v38 = vld [vmem:[%s1688_s1 + $0x640] sm:$0xff]  ;;  %v402_v39 = vld [vmem:[%s1688_s1 + $0x6c8] sm:$0xff] }
  0x61   : > { %653 = vmatpush.msra.mxu2 %v352_v40  ;;  %672 = vmatpush.msra.mxu3 %v369_v41  ;;  %v417_v40 = vld [vmem:[%s1688_s1 + $0x740] sm:$0xff]  ;;  %v434_v41 = vld [vmem:[%s1688_s1 + $0x7c8] sm:$0xff] }
  0x62   : > { %614 = vmatpush.msra.mxu0 %v319_v42  ;;  %633 = vmatpush.msra.mxu1 %v336_v43  ;;  %v384_v42 = vld [vmem:[%s1688_s1 + $0x638] sm:$0xff]  ;;  %v401_v43 = vld [vmem:[%s1688_s1 + $0x6c0] sm:$0xff] }
  0x63   : > { %654 = vmatpush.msra.mxu2 %v351_v44  ;;  %673 = vmatpush.msra.mxu3 %v368_v45  ;;  %v416_v44 = vld [vmem:[%s1688_s1 + $0x738] sm:$0xff]  ;;  %v433_v45 = vld [vmem:[%s1688_s1 + $0x7c0] sm:$0xff] }
  0x64   : > { %615 = vmatpush.msra.mxu0 %v318_v46  ;;  %634 = vmatpush.msra.mxu1 %v335_v47  ;;  %v383_v46 = vld [vmem:[%s1688_s1 + $0x630] sm:$0xff]  ;;  %v400_v47 = vld [vmem:[%s1688_s1 + $0x6b8] sm:$0xff] }
  0x65   : > { %655 = vmatpush.msra.mxu2 %v350_v48  ;;  %674 = vmatpush.msra.mxu3 %v367_v49  ;;  %v415_v48 = vld [vmem:[%s1688_s1 + $0x730] sm:$0xff]  ;;  %v432_v49 = vld [vmem:[%s1688_s1 + $0x7b8] sm:$0xff] }
  0x66   : > { %616 = vmatpush.msra.mxu0 %v317_v50  ;;  %635 = vmatpush.msra.mxu1 %v334_v51  ;;  %v382_v50 = vld [vmem:[%s1688_s1 + $0x628] sm:$0xff]  ;;  %v399_v51 = vld [vmem:[%s1688_s1 + $0x6b0] sm:$0xff] }
  0x67   : > { %656 = vmatpush.msra.mxu2 %v349_v52  ;;  %675 = vmatpush.msra.mxu3 %v366_v53  ;;  %v414_v52 = vld [vmem:[%s1688_s1 + $0x728] sm:$0xff]  ;;  %v431_v53 = vld [vmem:[%s1688_s1 + $0x7b0] sm:$0xff] }
  0x68   : > { %617 = vmatpush.msra.mxu0 %v316_v54  ;;  %636 = vmatpush.msra.mxu1 %v333_v55  ;;  %v381_v54 = vld [vmem:[%s1688_s1 + $0x620] sm:$0xff]  ;;  %v398_v55 = vld [vmem:[%s1688_s1 + $0x6a8] sm:$0xff] }
  0x69   : > { %657 = vmatpush.msra.mxu2 %v348_v56  ;;  %676 = vmatpush.msra.mxu3 %v365_v57  ;;  %v413_v56 = vld [vmem:[%s1688_s1 + $0x720] sm:$0xff]  ;;  %v430_v57 = vld [vmem:[%s1688_s1 + $0x7a8] sm:$0xff] }
  0x6a   : > { %618 = vmatpush.msra.mxu0 %v315_v58  ;;  %637 = vmatpush.msra.mxu1 %v332_v59  ;;  %v380_v58 = vld [vmem:[%s1688_s1 + $0x618] sm:$0xff]  ;;  %v397_v59 = vld [vmem:[%s1688_s1 + $0x6a0] sm:$0xff] }
  0x6b   : > { %658 = vmatpush.msra.mxu2 %v347_v60  ;;  %677 = vmatpush.msra.mxu3 %v364_v61  ;;  %v412_v60 = vld [vmem:[%s1688_s1 + $0x718] sm:$0xff]  ;;  %v429_v61 = vld [vmem:[%s1688_s1 + $0x7a0] sm:$0xff] }
  0x6c   : > { %619 = vmatpush.msra.mxu0 %v314_v62  ;;  %638 = vmatpush.msra.mxu1 %v331_v63  ;;  %v379_v62 = vld [vmem:[%s1688_s1 + $0x610] sm:$0xff]  ;;  %v396_v63 = vld [vmem:[%s1688_s1 + $0x698] sm:$0xff] }
  0x6d   : > { %659 = vmatpush.msra.mxu2 %v346_v0  ;;  %678 = vmatpush.msra.mxu3 %v363_v1  ;;  %v411_v0 = vld [vmem:[%s1688_s1 + $0x710] sm:$0xff]  ;;  %v428_v1 = vld [vmem:[%s1688_s1 + $0x798] sm:$0xff] }
  0x6e   : > { %620 = vmatpush.msra.mxu0 %v313_v2  ;;  %639 = vmatpush.msra.mxu1 %v330_v3  ;;  %v378_v2 = vld [vmem:[%s1688_s1 + $0x608] sm:$0xff]  ;;  %v395_v3 = vld [vmem:[%s1688_s1 + $0x690] sm:$0xff] }
  0x6f   : > { %660 = vmatpush.msra.mxu2 %v345_v4  ;;  %679 = vmatpush.msra.mxu3 %v362_v5  ;;  %v410_v4 = vld [vmem:[%s1688_s1 + $0x708] sm:$0xff]  ;;  %v427_v5 = vld [vmem:[%s1688_s1 + $0x790] sm:$0xff] }
  0x70   : > { %621 = vmatmul.f32.vlgmr.msra.gmra.mxu0 %v177_v6  ;;  %661 = vmatmul.f32.vlgmr.msra.gmra.mxu2 %v179_v7  ;;  %v377_v6 = vld [vmem:[%s1688_s1 + $0x600] sm:$0xff]  ;;  %v394_v7 = vld [vmem:[%s1688_s1 + $0x688] sm:$0xff] }
  0x71   : > { %685 = vmatpush.msrb.mxu0 %v392_v8  ;;  %725 = vmatpush.msrb.mxu2 %v424_v9  ;;  %v409_v8 = vld [vmem:[%s1688_s1 + $0x700] sm:$0xff]  ;;  %v426_v9 = vld [vmem:[%s1688_s1 + $0x788] sm:$0xff] }
  0x72   : > { %640 = vmatpush.msra.mxu1 %v329_v10  ;;  %680 = vmatpush.msra.mxu3 %v361_v11  ;;  %v181_v10 = vld [vmem:[%s1257_s10 + $0x60] sm:$0xff]  ;;  %v183_v11 = vld [vmem:[%s1257_s10 + $0x70] sm:$0xff] }
  0x73   : > { %641 = vmatmul.f32.vlgmr.msra.gmra.mxu1 %v178_v12  ;;  %681 = vmatmul.f32.vlgmr.msra.gmra.mxu3 %v180_v13  ;;  %v393_v12 = vld [vmem:[%s1688_s1 + $0x680] sm:$0xff] }
  0x74   : > { %686 = vmatpush.msrb.mxu0 %v391_v14  ;;  %705 = vmatpush.msrb.mxu1 %v408_v15  ;;  %v425_v13 = vld [vmem:[%s1688_s1 + $0x780] sm:$0xff]  ;;  %v182_v14 = vld [vmem:[%s1257_s10 + $0x68] sm:$0xff]  ;;  %v184_v15 = vld [vmem:[%s1257_s10 + $0x78] sm:$0xff]  ;;  %s826_s10 = sshll.u32 %s1693_s13, 3 }
  0x75   : > { %726 = vmatpush.msrb.mxu2 %v423_v16  ;;  %745 = vmatpush.msrb.mxu3 %v440_v17  ;;  %v838_v16 = vld [vmem:[%s1689_s2] ss:$0 sm:$0xff]  ;;  %s168_s21 = scalar_lea.vmem %s1690_s3, %s826_s10 }
  0x76   : > { %687 = vmatpush.msrb.mxu0 %v390_v18  ;;  %706 = vmatpush.msrb.mxu1 %v407_v19 }
  0x77   : > { %727 = vmatpush.msrb.mxu2 %v422_v20  ;;  %746 = vmatpush.msrb.mxu3 %v439_v21 }
  0x78   : > { %688 = vmatpush.msrb.mxu0 %v389_v22  ;;  %707 = vmatpush.msrb.mxu1 %v406_v23 }
  0x79   : > { %728 = vmatpush.msrb.mxu2 %v421_v24  ;;  %747 = vmatpush.msrb.mxu3 %v438_v25 }
  0x7a   : > { %689 = vmatpush.msrb.mxu0 %v388_v26  ;;  %708 = vmatpush.msrb.mxu1 %v405_v27 }
  0x7b   : > { %729 = vmatpush.msrb.mxu2 %v420_v28  ;;  %748 = vmatpush.msrb.mxu3 %v437_v29 }
  0x7c   : > { %690 = vmatpush.msrb.mxu0 %v387_v30  ;;  %709 = vmatpush.msrb.mxu1 %v404_v31 }
  0x7d   : > { %730 = vmatpush.msrb.mxu2 %v419_v32  ;;  %749 = vmatpush.msrb.mxu3 %v436_v33 }
  0x7e   : > { %691 = vmatpush.msrb.mxu0 %v386_v34  ;;  %710 = vmatpush.msrb.mxu1 %v403_v35 }
  0x7f   : > { %731 = vmatpush.msrb.mxu2 %v418_v36  ;;  %750 = vmatpush.msrb.mxu3 %v435_v37 }
  0x80   : > { %692 = vmatpush.msrb.mxu0 %v385_v38  ;;  %711 = vmatpush.msrb.mxu1 %v402_v39 }
  0x81   : > { %732 = vmatpush.msrb.mxu2 %v417_v40  ;;  %751 = vmatpush.msrb.mxu3 %v434_v41 }
  0x82   : > { %693 = vmatpush.msrb.mxu0 %v384_v42  ;;  %712 = vmatpush.msrb.mxu1 %v401_v43 }
  0x83   : > { %733 = vmatpush.msrb.mxu2 %v416_v44  ;;  %752 = vmatpush.msrb.mxu3 %v433_v45 }
  0x84   : > { %694 = vmatpush.msrb.mxu0 %v383_v46  ;;  %713 = vmatpush.msrb.mxu1 %v400_v47 }
  0x85   : > { %734 = vmatpush.msrb.mxu2 %v415_v48  ;;  %753 = vmatpush.msrb.mxu3 %v432_v49 }
  0x86   : > { %695 = vmatpush.msrb.mxu0 %v382_v50  ;;  %714 = vmatpush.msrb.mxu1 %v399_v51 }
  0x87   : > { %735 = vmatpush.msrb.mxu2 %v414_v52  ;;  %754 = vmatpush.msrb.mxu3 %v431_v53 }
  0x88   : > { %696 = vmatpush.msrb.mxu0 %v381_v54  ;;  %715 = vmatpush.msrb.mxu1 %v398_v55 }
  0x89   : > { %736 = vmatpush.msrb.mxu2 %v413_v56  ;;  %755 = vmatpush.msrb.mxu3 %v430_v57 }
  0x8a   : > { %697 = vmatpush.msrb.mxu0 %v380_v58  ;;  %716 = vmatpush.msrb.mxu1 %v397_v59 }
  0x8b   : > { %737 = vmatpush.msrb.mxu2 %v412_v60  ;;  %756 = vmatpush.msrb.mxu3 %v429_v61 }
  0x8c   : > { %698 = vmatpush.msrb.mxu0 %v379_v62  ;;  %717 = vmatpush.msrb.mxu1 %v396_v63 }
  0x8d   : > { %738 = vmatpush.msrb.mxu2 %v411_v0  ;;  %757 = vmatpush.msrb.mxu3 %v428_v1 }
  0x8e   : > { %699 = vmatpush.msrb.mxu0 %v378_v2  ;;  %718 = vmatpush.msrb.mxu1 %v395_v3 }
  0x8f   : > { %739 = vmatpush.msrb.mxu2 %v410_v4  ;;  %758 = vmatpush.msrb.mxu3 %v427_v5 }
  0x90   : > { %700 = vmatpush.msrb.mxu0 %v377_v6  ;;  %719 = vmatpush.msrb.mxu1 %v394_v7 }
  0x91   : > { %740 = vmatpush.msrb.mxu2 %v409_v8  ;;  %759 = vmatpush.msrb.mxu3 %v426_v9 }
  0x92   : > { %701 = vmatmul.f32.vlgmr.msrb.gmra.mxu0 %v181_v10  ;;  %741 = vmatmul.f32.vlgmr.msrb.gmra.mxu2 %v183_v11 }
  0x93   : > { %720 = vmatpush.msrb.mxu1 %v393_v12  ;;  %760 = vmatpush.msrb.mxu3 %v425_v13 }
  0x94   : > { %721 = vmatmul.f32.vlgmr.msrb.gmra.mxu1 %v182_v14  ;;  %761 = vmatmul.f32.vlgmr.msrb.gmra.mxu3 %v184_v15 }
  0xc9   : > { %v462_v17 = vpop.f32.mrf.mxu0 }
  0xca   : > { %v463_v18 = vadd.f32 %v838_v16, %v462_v17 }
  0xcc   : > { %v482_v19 = vpop.f32.mrf.mxu1 }
  0xcd   : > { %v483_v20 = vadd.f32 %v482_v19, %v463_v18 }
  0xcf   : > { %v502_v21 = vpop.f32.mrf.mxu2 }
  0xd0   : > { %v503_v22 = vadd.f32 %v502_v21, %v483_v20 }
  0xd2   : > { %v522_v23 = vpop.f32.mrf.mxu3 }
  0xd3   : > { %v523_v24 = vadd.f32 %v522_v23, %v503_v22 }
  0xd5   : > { %v542_v25 = vpop.f32.mrf.mxu0 }
  0xd6   : > { %v543_v26 = vadd.f32 %v542_v25, %v523_v24 }
  0xd8   : > { %v562_v27 = vpop.f32.mrf.mxu1 }
  0xd9   : > { %v563_v28 = vadd.f32 %v562_v27, %v543_v26  ;;  %v582_v29 = vpop.f32.mrf.mxu2 }
  0xdb   : > { %v583_v30 = vadd.f32 %v582_v29, %v563_v28 }
  0xdc   : > { %v602_v31 = vpop.f32.mrf.mxu3 }
  0xdd   : > { %v603_v33 = vadd.f32 %v602_v31, %v583_v30 }
  0xed   : > { %v622_v32 = vpop.f32.mrf.mxu0 }
  0xee   : > { %v623_v34 = vadd.f32 %v622_v32, %v603_v33 }
  0xf0   : > { %v642_v35 = vpop.f32.mrf.mxu1 }
  0xf1   : > { %v643_v37 = vadd.f32 %v642_v35, %v623_v34 }
  0xf3   : > { %v662_v36 = vpop.f32.mrf.mxu2 }
  0xf4   : > { %v663_v38 = vadd.f32 %v662_v36, %v643_v37 }
  0xf6   : > { %v682_v39 = vpop.f32.mrf.mxu3 }
  0xf7   : > { %v683_v40 = vadd.f32 %v682_v39, %v663_v38 }
 0x10f   : > { %v702_v41 = vpop.f32.mrf.mxu0 }
 0x110   : > { %v703_v42 = vadd.f32 %v702_v41, %v683_v40 }
 0x111   : > { %v722_v43 = vpop.f32.mrf.mxu1 }
 0x112   : > { %v723_v44 = vadd.f32 %v722_v43, %v703_v42 }
 0x115   : > { %v742_v45 = vpop.f32.mrf.mxu2 }
 0x116   : > { %v743_v46 = vadd.f32 %v742_v45, %v723_v44 }
 0x117   : > { %v762_v47 = vpop.f32.mrf.mxu3 }
 0x118   : > { %v763_v48 = vadd.f32 %v762_v47, %v743_v46 }
 0x11a   : > { %765 = vst [vmem:[%s168_s21] sm:$0xff] %v763_v48 }
 0x11b PF: > { %s13_s12 = sadd.s32 1, %s845_s12  }
 0x11c   : > { %p10_p4 = scmp.ge.s32.totalorder %s13_s12, 4  }
 0x11e   :  { %12 = sbr.rel (!%p10_p4) target bundleno = 1 (0x1), region = 62 }

</bundles_post_ra>
